<compile_context>
chip_gen: v7x
topology: tpu7x:2x2x1
jax: 0.10.0
libtpu: 0.0.40
codegen_flags: <defaults>
</compile_context>

<pallas_src>
import jax
import jax.numpy as jnp
from jax.experimental import pallas as pl
from jax.experimental.pallas import tpu as pltpu


def _round_up(n, m):
    return ((n + m - 1) // m) * m


def attentive_pool_kernel(x_ref, w1_ref, b1_ref, w2_ref, o_ref):
    # x_ref : (Bb, T, Dp)  block of batch rows, full sequence, padded features
    # w1_ref: (Dp, A)      attention_conv weight (transposed; zero rows for pad)
    # b1_ref: (1, A)       attention_conv bias
    # w2_ref: (1, A)       attention_score weight (row vector)
    # o_ref : (Bb, Dp)
    Bb, T, Dp = x_ref.shape

    x = x_ref[...]                                    # (Bb, T, Dp)
    x2 = x.reshape(Bb * T, Dp)                        # one big MXU matmul

    # tanh(Conv1d(D -> A, k=1)) == tanh(x @ W1^T + b1)
    a = jnp.tanh(
        jnp.dot(x2, w1_ref[...], preferred_element_type=jnp.float32)
        + b1_ref[...]
    )                                                 # (Bb*T, A) f32

    # Conv1d(A -> 1, k=1): VPU multiply + lane reduce (not an N=1 MXU matmul).
    # b2 is omitted: softmax over T is shift-invariant.
    s = jnp.sum(a * w2_ref[...], axis=-1, keepdims=True)   # (Bb*T, 1)
    s = s.reshape(Bb, T, 1)                                 # (Bb, T, 1)

    # Softmax over the sequence axis T, per batch row.
    m = jnp.max(s, axis=1, keepdims=True)             # (Bb, 1, 1)
    e = jnp.exp(s - m)                                # (Bb, T, 1)
    w = e / jnp.sum(e, axis=1, keepdims=True)         # (Bb, T, 1)

    # Weighted sum of the original features over T.
    out = jnp.sum(x.astype(jnp.float32) * w, axis=1)  # (Bb, Dp) f32
    o_ref[...] = out.astype(o_ref.dtype)


def attentive_pooling(x, w1, b1, w2, b2=None):
    """x: (B, T, D); w1: (A, D); b1: (A,); w2: (A,); b2: scalar -> (B, D).

    b2 is accepted for interface fidelity but is mathematically a no-op
    (softmax over T is shift-invariant), so it never reaches the kernel.
    """
    del b2
    B, T, D = x.shape
    A = w1.shape[0]

    # Lane-dense (multiple-of-128) feature dim.
    Dp = _round_up(D, 128)

    # Batch rows per grid step: as many as possible while keeping the
    # double-buffered x block small; multiple of 8 whenever the grid has >1 step
    # so the (block_b, Dp) output block satisfies the (8, 128) rule.
    bytes_per_row = T * Dp * x.dtype.itemsize
    max_rows = max(8, min(64, (4 * 1024 * 1024) // max(bytes_per_row, 1)))
    if B <= max_rows:
        block_b = B
    else:
        block_b = (max_rows // 8) * 8
    Bp = _round_up(B, block_b)

    xp = x
    if Dp != D:
        xp = jnp.pad(xp, ((0, 0), (0, 0), (0, Dp - D)))
    if Bp != B:
        xp = jnp.pad(xp, ((0, Bp - B), (0, 0), (0, 0)))

    w1_t = jnp.transpose(w1).astype(x.dtype)          # (D, A)
    if Dp != D:
        w1_t = jnp.pad(w1_t, ((0, Dp - D), (0, 0)))   # zero rows -> padded feats inert
    b1_r = b1.reshape(1, A).astype(jnp.float32)
    w2_r = w2.reshape(1, A).astype(jnp.float32)

    grid = (Bp // block_b,)

    out = pl.pallas_call(
        attentive_pool_kernel,
        out_shape=jax.ShapeDtypeStruct((Bp, Dp), x.dtype),
        grid_spec=pltpu.PrefetchScalarGridSpec(
            num_scalar_prefetch=0,
            grid=grid,
            in_specs=[
                pl.BlockSpec((block_b, T, Dp), lambda i: (i, 0, 0)),
                pl.BlockSpec((Dp, A), lambda i: (0, 0)),
                pl.BlockSpec((1, A), lambda i: (0, 0)),
                pl.BlockSpec((1, A), lambda i: (0, 0)),
            ],
            out_specs=pl.BlockSpec((block_b, Dp), lambda i: (i, 0)),
        ),
        compiler_params=pltpu.CompilerParams(
            dimension_semantics=("parallel",),
        ),
    )(xp, w1_t, b1_r, w2_r)

    return out[:B, :D]


def attentive_pooling_ref(x, w1, b1, w2, b2):
    # Pure-JAX reference mirroring the PyTorch forward (including b2).
    a = jnp.tanh(jnp.einsum("btd,ad->bta", x, w1) + b1[None, None, :])   # (B,T,A)
    s = jnp.einsum("bta,a->bt", a, w2) + b2                              # (B,T)
    w = jax.nn.softmax(s, axis=1)                                        # (B,T)
    return jnp.einsum("btd,bt->bd", x, w)                                # (B,D)


if __name__ == "__main__":
    B, T, D, A = 2, 8, 16, 128  # batch, seq, input_dim, attention_dim (default 128)

    key = jax.random.PRNGKey(0)
    kx, k1, k2, k3, k4 = jax.random.split(key, 5)

    x = jax.random.normal(kx, (B, T, D), dtype=jnp.float32)
    # Conv1d kernel_size=1 weights with the trailing length-1 kernel dim squeezed.
    w1 = jax.random.normal(k1, (A, D), dtype=jnp.float32) * 0.1   # attention_conv.weight
    b1 = jax.random.normal(k2, (A,), dtype=jnp.float32) * 0.1     # attention_conv.bias
    w2 = jax.random.normal(k3, (A,), dtype=jnp.float32) * 0.1     # attention_score.weight
    b2 = jax.random.normal(k4, (), dtype=jnp.float32) * 0.1       # attention_score.bias

    out = attentive_pooling(x, w1, b1, w2, b2)
    out = jax.block_until_ready(out)

    ref = attentive_pooling_ref(x, w1, b1, w2, b2)
    assert out.shape == (B, D)
    assert jnp.allclose(out, ref, atol=1e-5, rtol=1e-5), "mismatch vs reference"

    print("KERNEL_OK")
</pallas_src>

<mosaic_0001>
module attributes {stable_mosaic.version = 11 : i64} {
  func.func @attentive_pool_kernel(%arg0: i32, %arg1: memref<2x8x128xf32, #tpu.memory_space<vmem>>, %arg2: memref<128x128xf32, #tpu.memory_space<vmem>>, %arg3: memref<1x128xf32, #tpu.memory_space<vmem>>, %arg4: memref<1x128xf32, #tpu.memory_space<vmem>>, %arg5: memref<2x128xf32, #tpu.memory_space<vmem>>) attributes {dimension_semantics = [#tpu.dimension_semantics<parallel>], iteration_bounds = array<i64: 1>, scalar_prefetch = 0 : i64, scratch_operands = 0 : i64, tpu.core_type = #tpu.core_type<tc>, window_params = [{transform_indices = @transform_0, window_bounds = array<i64: 2, 8, 128>}, {pipeline_mode = #tpu.pipeline_mode<synchronous>, transform_indices = @transform_1, window_bounds = array<i64: 128, 128>}, {pipeline_mode = #tpu.pipeline_mode<synchronous>, transform_indices = @transform_2, window_bounds = array<i64: 1, 128>}, {pipeline_mode = #tpu.pipeline_mode<synchronous>, transform_indices = @transform_3, window_bounds = array<i64: 1, 128>}, {transform_indices = @transform_4, window_bounds = array<i64: 2, 128>}]} {
    %c0 = arith.constant 0 : index
    %c0_0 = arith.constant 0 : index
    %c0_1 = arith.constant 0 : index
    %0 = vector.load %arg1[%c0, %c0_0, %c0_1] : memref<2x8x128xf32, #tpu.memory_space<vmem>>, vector<2x8x128xf32>
    %1 = vector.shape_cast %0 : vector<2x8x128xf32> to vector<16x128xf32>
    %c0_2 = arith.constant 0 : index
    %c0_3 = arith.constant 0 : index
    %2 = vector.load %arg2[%c0_2, %c0_3] : memref<128x128xf32, #tpu.memory_space<vmem>>, vector<128x128xf32>
    %cst = arith.constant dense<0.000000e+00> : vector<16x128xf32>
    %3 = tpu.matmul %1, %2, %cst {dimension_numbers = #tpu.dot_dimension_numbers<[1], [0], [0], [1], [0, 0, 1, 1], [], []>} : vector<16x128xf32>, vector<128x128xf32>, vector<16x128xf32> -> vector<16x128xf32>
    %c0_4 = arith.constant 0 : index
    %c0_5 = arith.constant 0 : index
    %4 = vector.load %arg3[%c0_4, %c0_5] : memref<1x128xf32, #tpu.memory_space<vmem>>, vector<1x128xf32>
    %5 = vector.broadcast %4 : vector<1x128xf32> to vector<16x128xf32>
    %6 = arith.addf %3, %5 : vector<16x128xf32>
    %7 = math.tanh %6 : vector<16x128xf32>
    %c0_6 = arith.constant 0 : index
    %c0_7 = arith.constant 0 : index
    %8 = vector.load %arg4[%c0_6, %c0_7] : memref<1x128xf32, #tpu.memory_space<vmem>>, vector<1x128xf32>
    %9 = vector.broadcast %8 : vector<1x128xf32> to vector<16x128xf32>
    %10 = arith.mulf %7, %9 : vector<16x128xf32>
    %cst_8 = arith.constant dense<0.000000e+00> : vector<16xf32>
    %11 = vector.multi_reduction <add>, %10, %cst_8 [1] : vector<16x128xf32> to vector<16xf32>
    %12 = vector.shape_cast %11 : vector<16xf32> to vector<16x1xf32>
    %13 = vector.shape_cast %12 : vector<16x1xf32> to vector<2x8x1xf32>
    %cst_9 = arith.constant dense<0xFF800000> : vector<2x1xf32>
    %14 = vector.multi_reduction <maximumf>, %13, %cst_9 [1] : vector<2x8x1xf32> to vector<2x1xf32>
    %15 = vector.shape_cast %14 : vector<2x1xf32> to vector<2x1x1xf32>
    %16 = vector.broadcast %15 : vector<2x1x1xf32> to vector<2x8x1xf32>
    %17 = arith.subf %13, %16 : vector<2x8x1xf32>
    %18 = math.exp %17 : vector<2x8x1xf32>
    %cst_10 = arith.constant dense<0.000000e+00> : vector<2x1xf32>
    %19 = vector.multi_reduction <add>, %18, %cst_10 [1] : vector<2x8x1xf32> to vector<2x1xf32>
    %20 = vector.shape_cast %19 : vector<2x1xf32> to vector<2x1x1xf32>
    %21 = vector.broadcast %20 : vector<2x1x1xf32> to vector<2x8x1xf32>
    %22 = arith.divf %18, %21 : vector<2x8x1xf32>
    %23 = vector.broadcast %22 : vector<2x8x1xf32> to vector<2x8x128xf32>
    %24 = arith.mulf %0, %23 : vector<2x8x128xf32>
    %cst_11 = arith.constant dense<0.000000e+00> : vector<2x128xf32>
    %25 = vector.multi_reduction <add>, %24, %cst_11 [1] : vector<2x8x128xf32> to vector<2x128xf32>
    %c0_12 = arith.constant 0 : index
    %c0_13 = arith.constant 0 : index
    %26 = vector.load %arg5[%c0_12, %c0_13] : memref<2x128xf32, #tpu.memory_space<vmem>>, vector<2x128xf32>
    tpu.vector_store %arg5[%c0_12, %c0_13], %25 {strides = array<i32>} : memref<2x128xf32, #tpu.memory_space<vmem>>, vector<2x128xf32>,
    return
  }
  func.func @transform_0(%arg0: i32) -> (i32, i32, i32) {
    %c0_i32 = arith.constant 0 : i32
    %c0_i32_0 = arith.constant 0 : i32
    %c0_i32_1 = arith.constant 0 : i32
    return %arg0, %c0_i32, %c0_i32_0 : i32, i32, i32
  }
  func.func @transform_1(%arg0: i32) -> (i32, i32) {
    %c0_i32 = arith.constant 0 : i32
    %c0_i32_0 = arith.constant 0 : i32
    %c0_i32_1 = arith.constant 0 : i32
    return %c0_i32, %c0_i32_0 : i32, i32
  }
  func.func @transform_2(%arg0: i32) -> (i32, i32) {
    %c0_i32 = arith.constant 0 : i32
    %c0_i32_0 = arith.constant 0 : i32
    %c0_i32_1 = arith.constant 0 : i32
    return %c0_i32, %c0_i32_0 : i32, i32
  }
  func.func @transform_3(%arg0: i32) -> (i32, i32) {
    %c0_i32 = arith.constant 0 : i32
    %c0_i32_0 = arith.constant 0 : i32
    %c0_i32_1 = arith.constant 0 : i32
    return %c0_i32, %c0_i32_0 : i32, i32
  }
  func.func @transform_4(%arg0: i32) -> (i32, i32) {
    %c0_i32 = arith.constant 0 : i32
    %c0_i32_0 = arith.constant 0 : i32
    return %arg0, %c0_i32 : i32, i32
  }
}

</mosaic_0001>

<bundles_post_ra>
// kernel: tpu_custom_call.1
= control target key start
LH: loop header
LB: loop body
LE: loop exit
PB: predicated region body
PF: predicated region fallthrough
CT: control target
= control target key end

     0   :  { %9 = vsyncpa [#allocation3], 0  ;;  %s483_s0 = inlined_call_operand.hbm [shape: f32[2,8,128], index: 0, kind: input, shape index: {}]   ;;  %s484_s1 = inlined_call_operand.hbm [shape: f32[128,128], index: 1, kind: input, shape index: {}]   ;;  %s485_s2 = inlined_call_operand.vmem [shape: f32[1,128], index: 2, kind: input, shape index: {}]   ;;  %s486_s3 = inlined_call_operand.vmem [shape: f32[1,128], index: 3, kind: input, shape index: {}]   ;;  %s487_s4 = inlined_call_operand.hbm [shape: f32[2,128], index: 4, kind: output, shape index: {}]  }
   0x1   :  { %10 = vsyncpa [#allocation6], 0 }
   0x2   :  { %11 = vsyncpa [#allocation4], 0  ;;  %s407_s15 = smov [#allocation2]   ;;  %s335_s19 = scalar_lea.hbm %s483_s0, 256 }
   0x3   :  { %s17_s16 = sshll.u32 %s407_s15, 4  ;;  %p336_p0 = scmp.ne.s32.totalorder %s483_s0, %s335_s19  ;;  %s18_s16 = int_to_ptr.vmem [resolvable:$true] %s17_s16 }
   0x4   :  { %p339_p1 = scmp.lt.u32.totalorder %s335_s19, %s483_s0 }
   0x6   :  { %p341_p2 = pnand %p339_p1, %p336_p0 }
   0x8   :  { %344 = shalt.err (!%p341_p2)
}
   0x9   :  { %s345_s24 = scalar_lea.vmem %s18_s16, 256  ;;  %p350_p4 = scmp.lt.s32.totalorder %s18_s16, %s18_s16 }
   0xa   :  { %p346_p3 = scmp.ne.s32.totalorder %s18_s16, %s345_s24  ;;  %p351_p5 = scmp.lt.s32.totalorder %s345_s24, %s345_s24 }
   0xc   :  { %p352_p6 = por %p351_p5, %p350_p4 }
   0xe   :  { %p353_p7 = pnand %p352_p6, %p346_p3 }
  0x10   :  { %356 = shalt.err (!%p353_p7)
}
  0x11   :  { %s408_s25 = smov 128   ;;  %s409_s26 = smov 8  }
  0x12   :  { %23 = dma.hbm_to_vmem [thread:$0]  %s483_s0, 256, %s18_s16, [#allocation3], %s408_s25, %s408_s25, %s409_s26  }
  0x13   :  { %s410_s29 = smov [#allocation5]   ;;  %s357_s7 = scalar_lea.hbm %s484_s1, 2048 }
  0x14   :  { %s29_s30 = sshll.u32 %s410_s29, 4  ;;  %p358_p8 = scmp.ne.s32.totalorder %s484_s1, %s357_s7  ;;  %s30_s30 = int_to_ptr.vmem [resolvable:$true] %s29_s30 }
  0x15   :  { %p361_p9 = scmp.lt.u32.totalorder %s357_s7, %s484_s1 }
  0x17   :  { %p363_p10 = pnand %p361_p9, %p358_p8 }
  0x19   :  { %366 = shalt.err (!%p363_p10)
}
  0x1a   :  { %s367_s12 = scalar_lea.vmem %s30_s30, 2048  ;;  %p372_p12 = scmp.lt.s32.totalorder %s30_s30, %s30_s30 }
  0x1b   :  { %p368_p11 = scmp.ne.s32.totalorder %s30_s30, %s367_s12  ;;  %p373_p13 = scmp.lt.s32.totalorder %s367_s12, %s367_s12 }
  0x1d   :  { %p374_p0 = por %p373_p13, %p372_p12 }
  0x1f   :  { %p375_p1 = pnand %p374_p0, %p368_p11 }
  0x21   :  { %378 = shalt.err (!%p375_p1)
}
  0x22   :  { %35 = dma.hbm_to_vmem [thread:$0]  %s484_s1, 2048, %s30_s30, [#allocation6], %s408_s25, %s408_s25, %s409_s26  }
  0x23   :  { %401 = dma.done.wait [#allocation3], 256  }
  0x24   :  { %402 = vsyncadd [#allocation3], 4294967040 }
  0x25   :  { %403 = dma.done.wait [#allocation6], 2048  }
  0x26   :  { %404 = vsyncadd [#allocation6], 4294965248  ;;  %v48_v0 = vld [vmem:[#allocation5] sm:$0xff]  ;;  %v49_v1 = vld [vmem:[#allocation5 + $0x8] sm:$0xff]  ;;  %vm211_vm0 = vcmask 1041409  }
  0x27   :  { %v50_v2 = vld [vmem:[#allocation5 + $0x10] sm:$0xff]  ;;  %v286_v3 = vpack.c.bf16 %v49_v1, %v48_v0  ;;  %v51_v4 = vld [vmem:[#allocation5 + $0x18] sm:$0xff]  ;;  %v52_v6 = vld [vmem:[#allocation5 + $0x20] sm:$0xff] }
  0x28   :  { %v290_v5 = vpack.c.bf16 %v51_v4, %v50_v2  ;;  %v53_v7 = vld [vmem:[#allocation5 + $0x28] sm:$0xff]  ;;  %v461_v9 = vld [vmem:[#allocation2] sm:$0xff]  ;;  %v55_v11 = vld [vmem:[#allocation5 + $0x38] sm:$0xff] }
  0x29   :  { %287 = vmatprep.subr.bf16.mxu0 %v286_v3  ;;  %v294_v8 = vpack.c.bf16 %v53_v7, %v52_v6  ;;  %v54_v10 = vld [vmem:[#allocation5 + $0x30] sm:$0xff]  ;;  %283 = vmatprep.mubr.f32.mxu0 %v461_v9  ;;  %v56_v13 = vld [vmem:[#allocation5 + $0x40] sm:$0xff]  ;;  %v57_v14 = vld [vmem:[#allocation5 + $0x48] sm:$0xff] }
  0x2a   :  { %289 = vmatpush3.bf16.msra.mxu0 %v286_v3  ;;  %v298_v12 = vpack.c.bf16 %v55_v11, %v54_v10  ;;  %v302_v15 = vpack.c.bf16 %v57_v14, %v56_v13  ;;  %v58_v16 = vld [vmem:[#allocation5 + $0x50] sm:$0xff]  ;;  %v59_v17 = vld [vmem:[#allocation5 + $0x58] sm:$0xff]  ;;  %v60_v19 = vld [vmem:[#allocation5 + $0x60] sm:$0xff] }
  0x2b   :  { %291 = vmatprep.subr.bf16.mxu0 %v290_v5  ;;  %v306_v18 = vpack.c.bf16 %v59_v17, %v58_v16  ;;  %v61_v20 = vld [vmem:[#allocation5 + $0x68] sm:$0xff]  ;;  %v62_v22 = vld [vmem:[#allocation5 + $0x70] sm:$0xff]  ;;  %v63_v23 = vld [vmem:[#allocation5 + $0x78] sm:$0xff] }
  0x2c   :  { %v310_v21 = vpack.c.bf16 %v61_v20, %v60_v19  ;;  %v314_v24 = vpack.c.bf16 %v63_v23, %v62_v22  ;;  %v47_v25 = vld [vmem:[#allocation2 + $0x8] sm:$0xff]  ;;  %v231_v26 = vld [vmem:[%s485_s2] ss:$0 sm:$0xff]  ;;  %s411_s2 = smov [#allocation7]  }
  0x2d   :  { %v232_v31 = vld [vmem:[%s486_s3] ss:$0 sm:$0xff]  ;;  %s221_s3 = sshll.u32 %s411_s2, 4  ;;  %s222_s3 = int_to_ptr.vmem [resolvable:$true] %s221_s3 }
  0x2e   :  { %293 = vmatpush3.bf16.msra.mxu0 %v290_v5  ;;  %s379_s17 = scalar_lea.vmem %s222_s3, 32  ;;  %p384_p3 = scmp.lt.s32.totalorder %s222_s3, %s222_s3 }
  0x2f   :  { %295 = vmatprep.subr.bf16.mxu0 %v294_v8  ;;  %p380_p2 = scmp.ne.s32.totalorder %s222_s3, %s379_s17  ;;  %p385_p4 = scmp.lt.s32.totalorder %s379_s17, %s379_s17 }
  0x31   :  { %p386_p5 = por %p385_p4, %p384_p3 }
  0x32   :  { %297 = vmatpush3.bf16.msra.mxu0 %v294_v8 }
  0x33   :  { %299 = vmatprep.subr.bf16.mxu0 %v298_v12  ;;  %p387_p6 = pnand %p386_p5, %p380_p2 }
  0x36   :  { %301 = vmatpush3.bf16.msra.mxu0 %v298_v12 }
  0x37   :  { %303 = vmatprep.subr.bf16.mxu0 %v302_v15 }
  0x3a   :  { %305 = vmatpush3.bf16.msra.mxu0 %v302_v15 }
  0x3b   :  { %307 = vmatprep.subr.bf16.mxu0 %v306_v18 }
  0x3e   :  { %309 = vmatpush3.bf16.msra.mxu0 %v306_v18 }
  0x3f   :  { %311 = vmatprep.subr.bf16.mxu0 %v310_v21 }
  0x42   :  { %313 = vmatpush3.bf16.msra.mxu0 %v310_v21 }
  0x43   :  { %315 = vmatprep.subr.bf16.mxu0 %v314_v24 }
  0x46   :  { %317 = vmatpush3.bf16.msra.mxu0 %v314_v24 }
  0x49   :  { %284 = vmatmul.mubr.f32.vlgmr.msra.gmra.mrb[0].mxu0 %v47_v25 }
 0x11c   :  { %v285_v27 = vpop.f32.mrb[0].mxu0 }
 0x11d   :  { %v137_v28 = vpop.f32.mrb[1].mxu0  ;;  %v143_v29 = vadd.f32 %v285_v27, %v231_v26 }
 0x11e   :  { %v138_v30 = vadd.f32 %v231_v26, %v137_v28 }
 0x120   :  { %323 = vtanh.f32 %v138_v30 }
 0x121   :  { %325 = vtanh.f32 %v143_v29 }
 0x12a   :  { %v324_v32 = vpop.eup %323 }
 0x12b   :  { %v155_v33 = vmul.f32 %v324_v32, %v232_v31  ;;  %v326_v34 = vpop.eup %325 }
 0x12c   :  { %v156_v35 = vmul.f32 %v326_v34, %v232_v31 }
 0x12d   :  { %157 = vadd.xlane.f32.xlu0 %v155_v33 }
 0x131   :  { %159 = vadd.xlane.f32.xlu0 %v156_v35 }
 0x1ba   :  { %v158_v36 = vpop.xlane.xlu0 %157 }
 0x1bb   :  { %v161_v37 = vrot.slane %v158_v36, 4 }
 0x1bd   :  { %v162_v38 = vmax.f32 %v158_v36, %v161_v37 }
 0x1be   :  { %v160_v39 = vpop.xlane.xlu0 %159 }
 0x1bf   :  { %v163_v40 = vrot.slane %v162_v38, 2  ;;  %v167_v41 = vrot.slane %v160_v39, 4 }
 0x1c1   :  { %v164_v42 = vmax.f32 %v162_v38, %v163_v40  ;;  %v168_v43 = vmax.f32 %v160_v39, %v167_v41 }
 0x1c3   :  { %v165_v44 = vrot.slane %v164_v42, 1  ;;  %v169_v45 = vrot.slane %v168_v43, 2 }
 0x1c5   :  { %v166_v46 = vmax.f32 %v164_v42, %v165_v44  ;;  %v170_v47 = vmax.f32 %v168_v43, %v169_v45 }
 0x1c7   :  { %v173_v48 = vsub.f32 %v158_v36, %v166_v46  ;;  %v171_v49 = vrot.slane %v170_v47, 1 }
 0x1c9   :  { %v175_v50 = vmul.f32 1.442695, %v173_v48  ;;  %v172_v51 = vmax.f32 %v170_v47, %v171_v49 }
 0x1cb   :  { %327 = vpow2.f32 %v175_v50  ;;  %v174_v52 = vsub.f32 %v160_v39, %v172_v51 }
 0x1cd   :  { %v177_v53 = vmul.f32 1.442695, %v174_v52 }
 0x1cf   :  { %329 = vpow2.f32 %v177_v53 }
 0x1d5   :  { %v328_v54 = vpop.eup %327 }
 0x1d6   :  { %v179_v55 = vrot.slane %v328_v54, 4 }
 0x1d8   :  { %v180_v56 = vadd.f32 %v328_v54, %v179_v55 }
 0x1d9   :  { %v330_v57 = vpop.eup %329 }
 0x1da   :  { %v185_v58 = vrot.slane %v330_v57, 4  ;;  %v181_v59 = vrot.slane %v180_v56, 2 }
 0x1dc   :  { %v186_v60 = vadd.f32 %v330_v57, %v185_v58  ;;  %v182_v61 = vadd.f32 %v181_v59, %v180_v56 }
 0x1de   :  { %v187_v62 = vrot.slane %v186_v60, 2  ;;  %v183_v63 = vrot.slane %v182_v61, 1 }
 0x1e0   :  { %v184_v0 = vadd.f32 %v183_v63, %v182_v61  ;;  %v188_v1 = vadd.f32 %v187_v62, %v186_v60 }
 0x1e2   :  { %v189_v2 = vrot.slane %v188_v1, 1  ;;  %331 = vrcp.f32 %v184_v0 }
 0x1e4   :  { %v190_v3 = vadd.f32 %v189_v2, %v188_v1 }
 0x1e6   :  { %333 = vrcp.f32 %v190_v3 }
 0x1ec   :  { %v332_v4 = vpop.eup %331 }
 0x1ed   :  { %v192_v5 = vmul.f32 %v332_v4, %v328_v54 }
 0x1ef   :  { %v195_v6 = vmul.f32 %v192_v5, %v461_v9 }
 0x1f0   :  { %v334_v7 = vpop.eup %333 }
 0x1f1   :  { %v194_v8 = vmul.f32 %v334_v7, %v330_v57  ;;  %v197_v10 = vrot.slane %v195_v6, 4 }
 0x1f3   :  { %v196_v11 = vmul.f32 %v194_v8, %v47_v25  ;;  %v198_v12 = vadd.f32 %v197_v10, %v195_v6 }
 0x1f5   :  { %v199_v13 = vrot.slane %v198_v12, 2  ;;  %v203_v14 = vrot.slane %v196_v11, 4 }
 0x1f7   :  { %v200_v15 = vadd.f32 %v199_v13, %v198_v12  ;;  %v204_v16 = vadd.f32 %v203_v14, %v196_v11 }
 0x1f9   :  { %v205_v17 = vrot.slane %v204_v16, 2  ;;  %v201_v18 = vrot.slane %v200_v15, 1 }
 0x1fb   :  { %v206_v19 = vadd.f32 %v205_v17, %v204_v16  ;;  %v202_v21 = vadd.f32 %v201_v18, %v200_v15 }
 0x1fd   :  { %v207_v20 = vrot.slane %v206_v19, 1 }
 0x1ff   :  { %v208_v22 = vadd.f32 %v207_v20, %v206_v19 }
 0x201   :  { %v212_v9 = vsel %vm211_vm0, %v208_v22, %v202_v21 }
 0x202   :  { %214 = vst [vmem:[#allocation7] sm:$0x3] %v212_v9 }
 0x203   :  { %390 = shalt.err (!%p387_p6)
}
 0x204   :  { %s391_s20 = scalar_lea.hbm %s487_s4, 32 }
 0x205   :  { %p392_p7 = scmp.ne.s32.totalorder %s487_s4, %s391_s20  ;;  %p395_p8 = scmp.lt.u32.totalorder %s391_s20, %s487_s4 }
 0x207   :  { %p397_p9 = pnand %p395_p8, %p392_p7 }
 0x209   :  { %400 = shalt.err (!%p397_p9)
}
 0x20a   :  { %224 = dma.vmem_to_hbm [thread:$0]  %s222_s3, 32, %s487_s4, [#allocation4]  }
 0x20b   :  { %405 = dma.done.wait [#allocation4], 32  }
 0x20c   :  { %406 = vsyncadd [#allocation4], 4294967264 }
 0x20d   :  { %228 = vsyncpa [#allocation3], 1 }
 0x20e   :  { %229 = vsyncpa [#allocation6], 1 }
 0x20f   :  { %230 = vsyncpa [#allocation4], 1 }

</bundles_post_ra>
